<compile_context>
chip_gen: v7x
topology: tpu7x:2x2x1
jax: 0.10.0
libtpu: 0.0.40
codegen_flags: <defaults>
</compile_context>

<pallas_src>
import jax
import jax.numpy as jnp
from jax.experimental import pallas as pl
from jax.experimental.pallas import tpu as pltpu

_BN_EPS = 1e-5
_LANE = 128  # lane-dense output slab width for the 3-wide final layer


# ----------------------------- fused Pallas kernel ------------------------------ #

def _make_fused_mlp_kernel(num_blocks, has_output_layer, batch):
    """Builds a kernel over refs laid out as:
       x, (w, gamma, beta) * num_blocks, [w_out_padded, b_out_padded], o
    """
    inv_batch = 1.0 / float(batch)

    def kernel(*refs):
        x_ref = refs[0]
        o_ref = refs[-1]
        h = x_ref[...].astype(jnp.float32)
        idx = 1
        for _ in range(num_blocks):
            w_ref, gamma_ref, beta_ref = refs[idx], refs[idx + 1], refs[idx + 2]
            idx += 3
            # Linear (bias dropped -- cancelled exactly by BN's mean subtraction).
            y = jnp.dot(h, w_ref[...], preferred_element_type=jnp.float32)
            # BatchNorm1d, training-mode batch stats, single pass over y.
            mean = jnp.sum(y, axis=0, keepdims=True) * inv_batch          # (1, D)
            mean_sq = jnp.sum(y * y, axis=0, keepdims=True) * inv_batch   # (1, D)
            var = jnp.maximum(mean_sq - mean * mean, 0.0)
            scale = gamma_ref[...] * jax.lax.rsqrt(var + _BN_EPS)         # EUP rsqrt
            shift = beta_ref[...] - mean * scale
            # Folded BN affine + ReLU: one FMA + one max per element (VPU).
            h = jnp.maximum(y * scale + shift, 0.0)
        if has_output_layer:
            w_ref, b_ref = refs[idx], refs[idx + 1]
            h = jnp.dot(h, w_ref[...], preferred_element_type=jnp.float32) + b_ref[...]
        o_ref[...] = h.astype(o_ref.dtype)

    return kernel


# ------------------------------ host wrapper ------------------------------ #

def fused_mlp(x, block_params, out_params):
    """block_params: tuple of (w, b, gamma, beta); b is unused by the kernel.
       out_params:  (w_out, b_out) or None."""
    batch, d_in = x.shape
    inputs = [x]

    flops = 0
    transcendentals = 0
    bytes_accessed = x.size * x.dtype.itemsize

    d = d_in
    for (w, _b, gamma, beta) in block_params:
        inputs += [w, gamma, beta]
        flops += 2 * batch * w.shape[0] * w.shape[1] + 8 * batch * w.shape[1]
        transcendentals += w.shape[1]
        bytes_accessed += (w.size + gamma.size + beta.size) * 4
        d = w.shape[1]

    if out_params is not None:
        w_out, b_out = out_params
        n_out = w_out.shape[1]
        assert n_out <= _LANE
        # Zero-pad the tiny (d, 3) output layer to a lane-dense (d, 128) slab.
        w_pad = jnp.pad(w_out, ((0, 0), (0, _LANE - n_out)))
        b_pad = jnp.pad(b_out, ((0, 0), (0, _LANE - n_out)))
        inputs += [w_pad, b_pad]
        flops += 2 * batch * w_out.shape[0] * _LANE
        bytes_accessed += (w_pad.size + b_pad.size) * 4
        out_cols = _LANE
    else:
        out_cols = d
    bytes_accessed += batch * out_cols * 4

    vmem_spec = pl.BlockSpec(memory_space=pltpu.MemorySpace.VMEM)
    out = pl.pallas_call(
        _make_fused_mlp_kernel(len(block_params), out_params is not None, batch),
        out_shape=jax.ShapeDtypeStruct((batch, out_cols), x.dtype),
        in_specs=[vmem_spec] * len(inputs),
        out_specs=vmem_spec,
        cost_estimate=pl.CostEstimate(
            flops=flops,
            transcendentals=transcendentals,
            bytes_accessed=bytes_accessed,
        ),
    )(*inputs)

    if out_params is not None:
        out = out[:, : out_params[0].shape[1]]
    return out


mlp_forward = jax.jit(fused_mlp)


# --------------------------- parameter construction --------------------------- #

def init_mlp_params(key, input_dim, embed_dims, output_layer=False):
    """PyTorch-style init: Linear ~ U(-1/sqrt(fan_in), 1/sqrt(fan_in));
    BatchNorm gamma=1, beta=0.  Returns (blocks, out_params)."""
    blocks = []
    d_in = input_dim
    for d_out in embed_dims:
        key, kw, kb = jax.random.split(key, 3)
        bound = float(d_in) ** -0.5
        w = jax.random.uniform(kw, (d_in, d_out), jnp.float32, -bound, bound)
        b = jax.random.uniform(kb, (1, d_out), jnp.float32, -bound, bound)
        gamma = jnp.ones((1, d_out), jnp.float32)
        beta = jnp.zeros((1, d_out), jnp.float32)
        blocks.append((w, b, gamma, beta))
        d_in = d_out

    out_params = None
    if output_layer:
        key, kw, kb = jax.random.split(key, 3)
        bound = float(d_in) ** -0.5
        w = jax.random.uniform(kw, (d_in, 3), jnp.float32, -bound, bound)
        b = jax.random.uniform(kb, (1, 3), jnp.float32, -bound, bound)
        out_params = (w, b)
    return tuple(blocks), out_params


# Pure-JAX reference, faithful to the PyTorch module (includes the Linear bias,
# which the kernel drops because BN's mean subtraction cancels it exactly).
def mlp_forward_ref(x, block_params, out_params):
    h = x
    for (w, b, gamma, beta) in block_params:
        y = h @ w + b
        mean = jnp.mean(y, axis=0, keepdims=True)
        var = jnp.mean((y - mean) ** 2, axis=0, keepdims=True)
        y = (y - mean) * jax.lax.rsqrt(var + _BN_EPS)
        y = y * gamma + beta
        h = jnp.maximum(y, 0.0)
    if out_params is not None:
        w, b = out_params
        h = h @ w + b
    return h


if __name__ == "__main__":
    key = jax.random.PRNGKey(0)
    batch, input_dim = 8, 16
    embed_dims = (32, 32)

    kx, kp = jax.random.split(key)
    x = jax.random.normal(kx, (batch, input_dim), jnp.float32)
    block_params, out_params = init_mlp_params(
        kp, input_dim, embed_dims, output_layer=True)  # dropout=0 -> no dropout layers

    out = mlp_forward(x, block_params, out_params)
    out = jax.block_until_ready(out)

    ref = mlp_forward_ref(x, block_params, out_params)
    assert out.shape == (batch, 3), out.shape
    assert jnp.allclose(out, ref, atol=1e-4, rtol=1e-4), "mismatch vs reference"

    print("KERNEL_OK")
</pallas_src>

<mosaic_0001>
module attributes {stable_mosaic.version = 11 : i64} {
  func.func @kernel(%arg0: memref<8x16xf32, #tpu.memory_space<vmem>>, %arg1: memref<16x32xf32, #tpu.memory_space<vmem>>, %arg2: memref<1x32xf32, #tpu.memory_space<vmem>>, %arg3: memref<1x32xf32, #tpu.memory_space<vmem>>, %arg4: memref<32x32xf32, #tpu.memory_space<vmem>>, %arg5: memref<1x32xf32, #tpu.memory_space<vmem>>, %arg6: memref<1x32xf32, #tpu.memory_space<vmem>>, %arg7: memref<32x128xf32, #tpu.memory_space<vmem>>, %arg8: memref<1x128xf32, #tpu.memory_space<vmem>>, %arg9: memref<8x128xf32, #tpu.memory_space<vmem>>) attributes {dimension_semantics = [], scalar_prefetch = 0 : i64, scratch_operands = 0 : i64, tpu.core_type = #tpu.core_type<tc>} {
    %c0 = arith.constant 0 : index
    %c0_0 = arith.constant 0 : index
    %0 = vector.load %arg0[%c0, %c0_0] : memref<8x16xf32, #tpu.memory_space<vmem>>, vector<8x16xf32>
    %c0_1 = arith.constant 0 : index
    %c0_2 = arith.constant 0 : index
    %1 = vector.load %arg1[%c0_1, %c0_2] : memref<16x32xf32, #tpu.memory_space<vmem>>, vector<16x32xf32>
    %cst = arith.constant dense<0.000000e+00> : vector<8x32xf32>
    %2 = tpu.matmul %0, %1, %cst {dimension_numbers = #tpu.dot_dimension_numbers<[1], [0], [0], [1], [0, 0, 1, 1], [], []>} : vector<8x16xf32>, vector<16x32xf32>, vector<8x32xf32> -> vector<8x32xf32>
    %cst_3 = arith.constant dense<0.000000e+00> : vector<32xf32>
    %3 = vector.multi_reduction <add>, %2, %cst_3 [0] : vector<8x32xf32> to vector<32xf32>
    %4 = vector.shape_cast %3 : vector<32xf32> to vector<1x32xf32>
    %cst_4 = arith.constant 1.250000e-01 : f32
    %5 = vector.broadcast %cst_4 : f32 to vector<1x32xf32>
    %6 = arith.mulf %4, %5 : vector<1x32xf32>
    %7 = arith.mulf %2, %2 : vector<8x32xf32>
    %cst_5 = arith.constant dense<0.000000e+00> : vector<32xf32>
    %8 = vector.multi_reduction <add>, %7, %cst_5 [0] : vector<8x32xf32> to vector<32xf32>
    %9 = vector.shape_cast %8 : vector<32xf32> to vector<1x32xf32>
    %cst_6 = arith.constant 1.250000e-01 : f32
    %10 = vector.broadcast %cst_6 : f32 to vector<1x32xf32>
    %11 = arith.mulf %9, %10 : vector<1x32xf32>
    %12 = arith.mulf %6, %6 : vector<1x32xf32>
    %13 = arith.subf %11, %12 : vector<1x32xf32>
    %cst_7 = arith.constant 0.000000e+00 : f32
    %14 = vector.broadcast %cst_7 : f32 to vector<1x32xf32>
    %15 = arith.maximumf %13, %14 : vector<1x32xf32>
    %c0_8 = arith.constant 0 : index
    %c0_9 = arith.constant 0 : index
    %16 = vector.load %arg2[%c0_8, %c0_9] : memref<1x32xf32, #tpu.memory_space<vmem>>, vector<1x32xf32>
    %cst_10 = arith.constant 9.99999974E-6 : f32
    %17 = vector.broadcast %cst_10 : f32 to vector<1x32xf32>
    %18 = arith.addf %15, %17 : vector<1x32xf32>
    %19 = math.rsqrt %18 : vector<1x32xf32>
    %20 = arith.mulf %16, %19 : vector<1x32xf32>
    %c0_11 = arith.constant 0 : index
    %c0_12 = arith.constant 0 : index
    %21 = vector.load %arg3[%c0_11, %c0_12] : memref<1x32xf32, #tpu.memory_space<vmem>>, vector<1x32xf32>
    %22 = arith.mulf %6, %20 : vector<1x32xf32>
    %23 = arith.subf %21, %22 : vector<1x32xf32>
    %24 = vector.broadcast %20 : vector<1x32xf32> to vector<8x32xf32>
    %25 = arith.mulf %2, %24 : vector<8x32xf32>
    %26 = vector.broadcast %23 : vector<1x32xf32> to vector<8x32xf32>
    %27 = arith.addf %25, %26 : vector<8x32xf32>
    %cst_13 = arith.constant 0.000000e+00 : f32
    %28 = vector.broadcast %cst_13 : f32 to vector<8x32xf32>
    %29 = arith.maximumf %27, %28 : vector<8x32xf32>
    %c0_14 = arith.constant 0 : index
    %c0_15 = arith.constant 0 : index
    %30 = vector.load %arg4[%c0_14, %c0_15] : memref<32x32xf32, #tpu.memory_space<vmem>>, vector<32x32xf32>
    %cst_16 = arith.constant dense<0.000000e+00> : vector<8x32xf32>
    %31 = tpu.matmul %29, %30, %cst_16 {dimension_numbers = #tpu.dot_dimension_numbers<[1], [0], [0], [1], [0, 0, 1, 1], [], []>} : vector<8x32xf32>, vector<32x32xf32>, vector<8x32xf32> -> vector<8x32xf32>
    %cst_17 = arith.constant dense<0.000000e+00> : vector<32xf32>
    %32 = vector.multi_reduction <add>, %31, %cst_17 [0] : vector<8x32xf32> to vector<32xf32>
    %33 = vector.shape_cast %32 : vector<32xf32> to vector<1x32xf32>
    %cst_18 = arith.constant 1.250000e-01 : f32
    %34 = vector.broadcast %cst_18 : f32 to vector<1x32xf32>
    %35 = arith.mulf %33, %34 : vector<1x32xf32>
    %36 = arith.mulf %31, %31 : vector<8x32xf32>
    %cst_19 = arith.constant dense<0.000000e+00> : vector<32xf32>
    %37 = vector.multi_reduction <add>, %36, %cst_19 [0] : vector<8x32xf32> to vector<32xf32>
    %38 = vector.shape_cast %37 : vector<32xf32> to vector<1x32xf32>
    %cst_20 = arith.constant 1.250000e-01 : f32
    %39 = vector.broadcast %cst_20 : f32 to vector<1x32xf32>
    %40 = arith.mulf %38, %39 : vector<1x32xf32>
    %41 = arith.mulf %35, %35 : vector<1x32xf32>
    %42 = arith.subf %40, %41 : vector<1x32xf32>
    %cst_21 = arith.constant 0.000000e+00 : f32
    %43 = vector.broadcast %cst_21 : f32 to vector<1x32xf32>
    %44 = arith.maximumf %42, %43 : vector<1x32xf32>
    %c0_22 = arith.constant 0 : index
    %c0_23 = arith.constant 0 : index
    %45 = vector.load %arg5[%c0_22, %c0_23] : memref<1x32xf32, #tpu.memory_space<vmem>>, vector<1x32xf32>
    %cst_24 = arith.constant 9.99999974E-6 : f32
    %46 = vector.broadcast %cst_24 : f32 to vector<1x32xf32>
    %47 = arith.addf %44, %46 : vector<1x32xf32>
    %48 = math.rsqrt %47 : vector<1x32xf32>
    %49 = arith.mulf %45, %48 : vector<1x32xf32>
    %c0_25 = arith.constant 0 : index
    %c0_26 = arith.constant 0 : index
    %50 = vector.load %arg6[%c0_25, %c0_26] : memref<1x32xf32, #tpu.memory_space<vmem>>, vector<1x32xf32>
    %51 = arith.mulf %35, %49 : vector<1x32xf32>
    %52 = arith.subf %50, %51 : vector<1x32xf32>
    %53 = vector.broadcast %49 : vector<1x32xf32> to vector<8x32xf32>
    %54 = arith.mulf %31, %53 : vector<8x32xf32>
    %55 = vector.broadcast %52 : vector<1x32xf32> to vector<8x32xf32>
    %56 = arith.addf %54, %55 : vector<8x32xf32>
    %cst_27 = arith.constant 0.000000e+00 : f32
    %57 = vector.broadcast %cst_27 : f32 to vector<8x32xf32>
    %58 = arith.maximumf %56, %57 : vector<8x32xf32>
    %c0_28 = arith.constant 0 : index
    %c0_29 = arith.constant 0 : index
    %59 = vector.load %arg7[%c0_28, %c0_29] : memref<32x128xf32, #tpu.memory_space<vmem>>, vector<32x128xf32>
    %cst_30 = arith.constant dense<0.000000e+00> : vector<8x128xf32>
    %60 = tpu.matmul %58, %59, %cst_30 {dimension_numbers = #tpu.dot_dimension_numbers<[1], [0], [0], [1], [0, 0, 1, 1], [], []>} : vector<8x32xf32>, vector<32x128xf32>, vector<8x128xf32> -> vector<8x128xf32>
    %c0_31 = arith.constant 0 : index
    %c0_32 = arith.constant 0 : index
    %61 = vector.load %arg8[%c0_31, %c0_32] : memref<1x128xf32, #tpu.memory_space<vmem>>, vector<1x128xf32>
    %62 = vector.broadcast %61 : vector<1x128xf32> to vector<8x128xf32>
    %63 = arith.addf %60, %62 : vector<8x128xf32>
    %c0_33 = arith.constant 0 : index
    %c0_34 = arith.constant 0 : index
    %64 = vector.load %arg9[%c0_33, %c0_34] : memref<8x128xf32, #tpu.memory_space<vmem>>, vector<8x128xf32>
    tpu.vector_store %arg9[%c0_33, %c0_34], %63 {strides = array<i32>} : memref<8x128xf32, #tpu.memory_space<vmem>>, vector<8x128xf32>,
    return
  }
}

</mosaic_0001>

<bundles_post_ra>
// kernel: fused_mlp.1
= control target key start
LH: loop header
LB: loop body
LE: loop exit
PB: predicated region body
PF: predicated region fallthrough
CT: control target
= control target key end

     0   :  { %v428_v0 = vmov 0.0|0.0   ;;  %vm429_vm0 = vmmov 0   ;;  %v430_v3 = vmov 0.0   ;;  %vm35_vm1 = vcmask 130048   ;;  %s543_s1 = inlined_call_operand.vmem [shape: f32[16,32], index: 1, kind: input, shape index: {}]   ;;  %s544_s0 = inlined_call_operand.vmem [shape: f32[8,16], index: 0, kind: input, shape index: {}]   ;;  %s545_s4 = inlined_call_operand.vmem [shape: f32[32,32], index: 4, kind: input, shape index: {}]   ;;  %s546_s2 = inlined_call_operand.vmem [shape: f32[1,32], index: 2, kind: input, shape index: {}]   ;;  %s547_s3 = inlined_call_operand.vmem [shape: f32[1,32], index: 3, kind: input, shape index: {}]   ;;  %s548_s7 = inlined_call_operand.vmem [shape: f32[32,128], index: 7, kind: input, shape index: {}]   ;;  %s549_s5 = inlined_call_operand.vmem [shape: f32[1,32], index: 5, kind: input, shape index: {}]   ;;  %s550_s6 = inlined_call_operand.vmem [shape: f32[1,32], index: 6, kind: input, shape index: {}]   ;;  %s551_s8 = inlined_call_operand.vmem [shape: f32[1,128], index: 8, kind: input, shape index: {}]   ;;  %s552_s9 = inlined_call_operand.vmem [shape: f32[8,128], index: 9, kind: output, shape index: {}]  }
   0x1   :  { %406 = vmatprep.subr.bf16.mxu0 %v428_v0  ;;  %v33_v1 = vld [vmem:[%s543_s1] sm:$0xff]  ;;  %v34_v2 = vld [vmem:[%s543_s1 + $0x8] sm:$0xff]  ;;  %381 = vmatprep.mubr.msk.f32.mxu0 %vm429_vm0, %v430_v3  ;;  %v154_v9 = vld [vmem:[%s545_s4 + $0x10] sm:$0xff]  ;;  %vm109_vm2 = vcmask 261120   ;;  %v138_v35 = vlaneseq }
   0x2   :  { %v407_v4 = vpack.c.bf16 %v34_v2, %v33_v1  ;;  %409 = vmatprep.subr.bf16.mxu1 %v428_v0  ;;  %392 = vmatprep.mubr.msk.f32.mxu1 %vm429_vm0, %v430_v3  ;;  %v32_v5 = vld [vmem:[%s544_s0] sm:$0xff]  ;;  %v153_v7 = vld [vmem:[%s545_s4 + $0x8] sm:$0xff]  ;;  %v155_v10 = vld [vmem:[%s545_s4 + $0x18] sm:$0xff] }
   0x3   :  { %v152_v6 = vld [vmem:[%s545_s4] sm:$0xff]  ;;  %v413_v11 = vpack.c.bf16 %v155_v10, %v154_v9  ;;  %v139_v36 = vshrl.u32 %v138_v35, 7  ;;  %v272_v50 = vld [vmem:[%s548_s7 + $0x8] sm:$0xff]  ;;  %v273_v52 = vld [vmem:[%s548_s7 + $0x10] sm:$0xff] }
   0x4   :  { %408 = vmatpush3.bf16.msra.mxu0 %v407_v4  ;;  %v410_v8 = vpack.c.bf16 %v153_v7, %v152_v6  ;;  %v130_v37 = vld [vmem:[%s546_s2] sm:$0x1]  ;;  %v274_v53 = vld [vmem:[%s548_s7 + $0x18] sm:$0xff] }
   0x5   :  { %415 = vmatprep.subr.bf16.mxu0 %v428_v0  ;;  %v140_v38 = vsub.s32 0, %v139_v36  ;;  %v134_v41 = vld [vmem:[%s547_s3] sm:$0x1]  ;;  %v419_v54 = vpack.c.bf16 %v274_v53, %v273_v52 }
   0x6   :  { %411 = vmatpush3.bf16.msra.mxu1 %v410_v8  ;;  %v271_v49 = vld [vmem:[%s548_s7] sm:$0xff] }
   0x7   :  { %382 = vmatmul.mubr.msk.f32.vlgmr.msra.gmra.mrb[0].mxu0 %vm35_vm1, %v32_v5  ;;  %412 = vmatprep.subr.bf16.mxu1 %v428_v0  ;;  %v416_v51 = vpack.c.bf16 %v272_v50, %v271_v49 }
   0x8   :  { %403 = vmatprep.mubr.msk.f32.mxu0 %vm429_vm0, %v430_v3 }
   0x9   :  { %417 = vmatpush3.bf16.msra.mxu0 %v416_v51 }
   0xa   :  { %414 = vmatpush3.bf16.msra.mxu1 %v413_v11  ;;  %418 = vmatprep.subr.bf16.mxu0 %v428_v0 }
   0xd   :  { %420 = vmatpush3.bf16.msra.mxu0 %v419_v54 }
  0xda   :  { %v105_v12 = vpop.f32.mrb[0].mxu0 }
  0xdb   :  { %v110_v13 = vsel %vm109_vm2, %v105_v12, 0.0  ;;  %v118_v14 = vmul.f32 %v105_v12, %v105_v12  ;;  %v383_v15 = vpop.f32.mrb[1].mxu0 }
  0xdc   :  { %v111_v16 = vrot.slane %v110_v13, 4 }
  0xdd   :  { %v119_v17 = vsel %vm109_vm2, %v118_v14, 0.0  ;;  %v249_v14 = vld [vmem:[%s549_s5] sm:$0x1] }
  0xde   :  { %v112_v18 = vadd.f32 %v111_v16, %v110_v13  ;;  %v120_v19 = vrot.slane %v119_v17, 4 }
  0xe0   :  { %v113_v20 = vrot.slane %v112_v18, 2  ;;  %v121_v21 = vadd.f32 %v120_v19, %v119_v17  ;;  %v253_v17 = vld [vmem:[%s550_s6] sm:$0x1] }
  0xe2   :  { %v114_v22 = vadd.f32 %v113_v20, %v112_v18  ;;  %v122_v23 = vrot.slane %v121_v21, 2 }
  0xe4   :  { %v115_v24 = vrot.slane %v114_v22, 1  ;;  %v123_v25 = vadd.f32 %v122_v23, %v121_v21 }
  0xe6   :  { %v116_v26 = vadd.f32 %v115_v24, %v114_v22  ;;  %v124_v27 = vrot.slane %v123_v25, 1 }
  0xe8   :  { %v117_v28 = vmul.f32 0.125, %v116_v26  ;;  %v125_v29 = vadd.f32 %v124_v27, %v123_v25  ;;  %v362_v25 = vld [vmem:[%s551_s8] ss:$0 sm:$0xff] }
  0xea   :  { %v126_v30 = vmul.f32 0.125, %v125_v29  ;;  %v127_v31 = vmul.f32 %v117_v28, %v117_v28 }
  0xec   :  { %v128_v32 = vsub.f32 %v126_v30, %v127_v31 }
  0xee   :  { %v129_v33 = vmax.f32 %v128_v32, 0.0 }
  0xf0   :  { %v131_v34 = vadd.f32 1e-05, %v129_v33 }
  0xf2   :  { %424 = vrsqrt.f32 %v131_v34 }
  0xfc   :  { %v425_v39 = vpop.eup %424 }
  0xfd   :  { %v133_v40 = vmul.f32 %v425_v39, %v130_v37 }
  0xff   :  { %v135_v42 = vmul.f32 %v133_v40, %v117_v28  ;;  %v141_v43 = vrot.slane %v133_v40, %v140_v38 }
 0x101   :  { %v136_v44 = vsub.f32 %v134_v41, %v135_v42  ;;  %v143_v45 = vmul.f32 %v141_v43, %v105_v12 }
 0x103   :  { %v148_v46 = vrot.slane %v136_v44, %v140_v38 }
 0x105   :  { %v150_v47 = vadd.f32 %v148_v46, %v143_v45 }
 0x107   :  { %v151_v48 = vmax.f32 %v150_v47, 0.0 }
 0x109   :  { %393 = vmatmul.mubr.msk.f32.vlgmr.msra.gmra.mrb[0].mxu1 %vm109_vm2, %v151_v48 }
 0x1dc   :  { %v225_v55 = vpop.f32.mrb[0].mxu1 }
 0x1dd   :  { %v229_v56 = vsel %vm109_vm2, %v225_v55, 0.0  ;;  %v237_v57 = vmul.f32 %v225_v55, %v225_v55  ;;  %v394_v58 = vpop.f32.mrb[1].mxu1 }
 0x1de   :  { %v230_v59 = vrot.slane %v229_v56, 4 }
 0x1df   :  { %v238_v60 = vsel %vm109_vm2, %v237_v57, 0.0 }
 0x1e0   :  { %v231_v61 = vadd.f32 %v230_v59, %v229_v56  ;;  %v239_v62 = vrot.slane %v238_v60, 4 }
 0x1e2   :  { %v232_v63 = vrot.slane %v231_v61, 2  ;;  %v240_v0 = vadd.f32 %v239_v62, %v238_v60 }
 0x1e4   :  { %v233_v1 = vadd.f32 %v232_v63, %v231_v61  ;;  %v241_v2 = vrot.slane %v240_v0, 2 }
 0x1e6   :  { %v234_v3 = vrot.slane %v233_v1, 1  ;;  %v242_v4 = vadd.f32 %v241_v2, %v240_v0 }
 0x1e8   :  { %v235_v5 = vadd.f32 %v234_v3, %v233_v1  ;;  %v243_v6 = vrot.slane %v242_v4, 1 }
 0x1ea   :  { %v236_v7 = vmul.f32 0.125, %v235_v5  ;;  %v244_v8 = vadd.f32 %v243_v6, %v242_v4 }
 0x1ec   :  { %v245_v9 = vmul.f32 0.125, %v244_v8  ;;  %v246_v10 = vmul.f32 %v236_v7, %v236_v7 }
 0x1ee   :  { %v247_v11 = vsub.f32 %v245_v9, %v246_v10 }
 0x1f0   :  { %v248_v12 = vmax.f32 %v247_v11, 0.0 }
 0x1f2   :  { %v250_v13 = vadd.f32 1e-05, %v248_v12 }
 0x1f4   :  { %426 = vrsqrt.f32 %v250_v13 }
 0x1fe   :  { %v427_v15 = vpop.eup %426 }
 0x1ff   :  { %v252_v16 = vmul.f32 %v427_v15, %v249_v14 }
 0x201   :  { %v254_v18 = vmul.f32 %v252_v16, %v236_v7  ;;  %v260_v19 = vrot.slane %v252_v16, %v140_v38 }
 0x203   :  { %v255_v20 = vsub.f32 %v253_v17, %v254_v18  ;;  %v262_v21 = vmul.f32 %v260_v19, %v225_v55 }
 0x205   :  { %v267_v22 = vrot.slane %v255_v20, %v140_v38 }
 0x207   :  { %v269_v23 = vadd.f32 %v267_v22, %v262_v21 }
 0x209   :  { %v270_v24 = vmax.f32 %v269_v23, 0.0 }
 0x20b   :  { %404 = vmatmul.mubr.msk.f32.vlgmr.msra.gmra.mrb[2].mxu0 %vm109_vm2, %v270_v24 }
 0x2de   :  { %v351_v26 = vpop.f32.mrb[2].mxu0 }
 0x2df   :  { %v352_v27 = vadd.f32 %v362_v25, %v351_v26  ;;  %v405_v28 = vpop.f32.mrb[3].mxu0 }
 0x2e1   :  { %355 = vst [vmem:[%s552_s9] sm:$0xff] %v352_v27 }

</bundles_post_ra>
